<compile_context>
chip_gen: v7x
topology: tpu7x:2x2x1
jax: 0.10.0
libtpu: 0.0.40
codegen_flags: <defaults>
</compile_context>

<pallas_src>
import math
import functools

import jax
import jax.numpy as jnp
from jax.experimental import pallas as pl
from jax.experimental.pallas import tpu as pltpu


def _sentence_attention_kernel(
    x_ref,        # (Bt, Sp, E)   bf16 batch tile
    w_all_ref,    # (E, 3*Ep)     bf16  fused in-proj weights [k | v | q/S]
    b_all_ref,    # (1, 3*Ep)     f32   fused in-proj biases  [bk | 0 | bv | 0 | 0 | 0]
    bq_ref,       # (1, E)        f32   fused query bias (added once)
    wo_ref,       # (E, E)        bf16  out_proj weight
    bo_ref,       # (1, E)        f32   out_proj bias
    hsel_ref,     # (E, H)        bf16  one-hot head selector
    hselT_ref,    # (H, E)        bf16  its transpose
    out_ref,      # (Bt, E)       f32
    *, num_heads: int, e_pad: int, seq_valid: int,
):
    f32, bf16 = jnp.float32, jnp.bfloat16
    x = x_ref[...]                                   # (Bt, Sp, E) bf16
    bt, sp, e = x.shape
    x2 = x.reshape(bt * sp, e)                       # view: Sp % 8 == 0

    # one wide bf16 MXU matmul for the k / v / q projections, f32 accumulate
    y = jnp.dot(x2, w_all_ref[...], preferred_element_type=f32) + b_all_ref[...]
    k = y[:, 0:e]                                    # (Bt*Sp, E)
    v = y[:, e_pad:e_pad + e]                        # (Bt*Sp, E)
    # seq-mean folded into the weights (Wq/S); zero-padded rows contribute 0
    q = jnp.sum(y[:, 2 * e_pad:2 * e_pad + e].reshape(bt, sp, e), axis=1) + bq_ref[...]

    # scores[b, s, h] = sum_{lanes of head h} q[b, :] * k[b, s, :]
    qk = (k.reshape(bt, sp, e) * q[:, None, :]).astype(bf16)
    scores = jnp.dot(qk.reshape(bt * sp, e), hsel_ref[...],
                     preferred_element_type=f32).reshape(bt, sp, num_heads)

    if seq_valid != sp:  # mask padded key rows out of the softmax
        pos = jax.lax.broadcasted_iota(jnp.int32, (1, sp, num_heads), 1)
        scores = jnp.where(pos < seq_valid, scores, jnp.float32(-1e30))

    # softmax over the sequence (sublane) axis, in f32
    # TODO(synk): on v5e with S >> E/H, transpose scores to (Bt*H, S) for a
    # lane-dense softmax; secondary to the matmul dtype changes.
    scores = scores - jnp.max(scores, axis=1, keepdims=True)
    p = jnp.exp(scores)
    p = p * pl.reciprocal(jnp.sum(p, axis=1, keepdims=True), approx=True)
    # TODO(synk): attention dropout (p=0.1) omitted -- eval-mode forward only.

    # attn[b, e] = sum_s p[b, s, head(e)] * v[b, s, e]
    p_full = jnp.dot(p.reshape(bt * sp, num_heads).astype(bf16), hselT_ref[...],
                     preferred_element_type=f32)                      # (Bt*Sp, E)
    attn = jnp.sum((p_full * v).reshape(bt, sp, e), axis=1)           # (Bt, E)

    out_ref[...] = (jnp.dot(attn.astype(bf16), wo_ref[...],
                            preferred_element_type=f32) + bo_ref[...])


def _physical_vmem_bytes():
    try:
        return int(pltpu.get_tpu_info().vmem_capacity_bytes)
    except Exception:
        return 64 << 20  # conservative (v7x-sized) fallback


def _estimate_vmem_bytes(block_b, sp, e, e_pad, h):
    bf2, f4 = 2, 4
    rows = block_b * sp
    x_io = 2 * rows * e * bf2                     # double-buffered bf16 input tile
    out_io = 2 * block_b * e * f4                 # double-buffered f32 output tile
    consts = 2 * ((3 * e * e_pad + e * e + 2 * e * h) * bf2
                  + (3 * e_pad + 2 * e) * f4)     # conservative: assume 2 buffers
    inter = rows * (3 * e_pad + 6 * e) * f4       # y, k/v/qk/p_full/(p_full*v) peak
    return x_io + out_io + consts + inter + (2 << 20)


def _choose_block_b(batch, sp, e, e_pad, h, *, target_rows, budget_bytes, min_steps=2):
    divs = [d for d in range(1, batch + 1) if batch % d == 0]
    # sublane-aligned output blocks (multiple of 8, or the whole batch) avoid
    # masked partial stores on the (block_b, E) output slab
    aligned = [d for d in divs if d % 8 == 0 or d == batch]
    multi = [d for d in aligned if batch // d >= min_steps]  # >=2 steps: v7x 2 TCs
    pool = multi or aligned or divs
    want = max(1, target_rows // max(sp, 1))
    under = [d for d in pool if d <= want]
    block_b = max(under) if under else min(pool)
    # shrink (preferring aligned divisors) until the VMEM estimate fits
    while block_b > 1 and _estimate_vmem_bytes(block_b, sp, e, e_pad, h) > budget_bytes:
        smaller = ([d for d in aligned if d < block_b]
                   or [d for d in divs if d < block_b])
        if not smaller:
            break
        block_b = max(smaller)
    return block_b


def sentence_attention(x, params, *, num_heads, block_b=None,
                       single_buffer_constants=True):
    """x: (B, S, E) float32.
    params (all (in, out) weights / (E,) biases):
      (wq, bq, we, be, wiq, biq, wik, bik, wiv, biv, wo, bo)."""
    B, S, E = x.shape
    assert E % num_heads == 0
    d = E // num_heads
    (wq, bq, we, be, wiq, biq, wik, bik, wiv, biv, wo, bo) = params

    f32, bf16 = jnp.float32, jnp.bfloat16

    # ---- algebraic fusion (exact, done once in f32 outside the kernel) ------
    scale = 1.0 / math.sqrt(d)
    wq_f = (wq.astype(f32) @ wiq.astype(f32)) * scale
    bq_f = (bq.astype(f32) @ wiq.astype(f32) + biq.astype(f32)) * scale
    wk_f = we.astype(f32) @ wik.astype(f32)
    bk_f = be.astype(f32) @ wik.astype(f32) + bik.astype(f32)
    wv_f = we.astype(f32) @ wiv.astype(f32)
    bv_f = be.astype(f32) @ wiv.astype(f32) + biv.astype(f32)

    # one (E, 3*Ep) fused in-proj weight: [k | v | q/S], 128-lane aligned blocks
    e_pad = ((E + 127) // 128) * 128
    w_all = jnp.zeros((E, 3 * e_pad), f32)
    w_all = w_all.at[:, 0:E].set(wk_f)
    w_all = w_all.at[:, e_pad:e_pad + E].set(wv_f)
    w_all = w_all.at[:, 2 * e_pad:2 * e_pad + E].set(wq_f / S)  # seq-mean folded
    b_all = jnp.zeros((3 * e_pad,), f32)
    b_all = b_all.at[0:E].set(bk_f).at[e_pad:e_pad + E].set(bv_f)
    # (q bias added once in-kernel so zero-padded seq rows stay exact)

    # 0/1 head selector: hsel[e, h] = 1 iff lane e belongs to head h
    hsel = (jnp.arange(E)[:, None] // d == jnp.arange(num_heads)[None, :]).astype(bf16)
    hselT = hsel.T

    # MXU operands in bf16 (f32 accumulation inside the kernel)
    # TODO(synk): optional fp8 weight storage for v7x not implemented.
    x_bf = x.astype(bf16)
    w_all_bf = w_all.astype(bf16)
    wo_bf = wo.astype(bf16)

    # pad S to a sublane multiple so in-kernel reshapes stay views
    s_pad = ((S + 7) // 8) * 8
    if s_pad != S:
        x_bf = jnp.pad(x_bf, ((0, 0), (0, s_pad - S), (0, 0)))

    # ---- generation-aware tiling / VMEM budget ------------------------------
    phys_vmem = _physical_vmem_bytes()
    budget = int(phys_vmem * 0.8)                    # leave compiler headroom
    target_rows = 512 if phys_vmem >= (96 << 20) else 256
    if block_b is None:
        block_b = _choose_block_b(B, s_pad, E, e_pad, num_heads,
                                  target_rows=target_rows, budget_bytes=budget)
    assert B % block_b == 0
    grid = (B // block_b,)
    vmem_limit = budget

    kernel = functools.partial(_sentence_attention_kernel, num_heads=num_heads,
                               e_pad=e_pad, seq_valid=S)

    def const_spec(shape):
        zero = (0,) * len(shape)
        if single_buffer_constants:
            # grid-invariant operand: fetched once, single VMEM buffer
            return pl.BlockSpec(shape, lambda b: zero,
                                pipeline_mode=pl.Buffered(1))
        return pl.BlockSpec(shape, lambda b: zero)

    out = pl.pallas_call(
        kernel,
        out_shape=jax.ShapeDtypeStruct((B, E), jnp.float32),
        grid=grid,
        in_specs=[
            pl.BlockSpec((block_b, s_pad, E), lambda b: (b, 0, 0)),
            const_spec((E, 3 * e_pad)),
            const_spec((1, 3 * e_pad)),
            const_spec((1, E)),
            const_spec((E, E)),
            const_spec((1, E)),
            const_spec((E, num_heads)),
            const_spec((num_heads, E)),
        ],
        out_specs=pl.BlockSpec((block_b, E), lambda b: (b, 0)),
        compiler_params=pltpu.CompilerParams(
            dimension_semantics=("parallel",),
            vmem_limit_bytes=int(vmem_limit),
        ),
    )(
        x_bf,
        w_all_bf, b_all[None, :], bq_f[None, :],
        wo_bf, bo.astype(f32)[None, :],
        hsel, hselT,
    )
    return out                                        # (B, E)


def _reference(x, params, num_heads):
    """Pure-JAX reference of the PyTorch forward (eval mode, unfused f32 math)."""
    (wq, bq, we, be, wiq, biq, wik, bik, wiv, biv, wo, bo) = params
    B, S, E = x.shape
    d = E // num_heads
    q = jnp.mean(x @ wq + bq, axis=1, keepdims=True)         # (B, 1, E)
    kv = x @ we + be                                          # (B, S, E)
    qq = (q @ wiq + biq).reshape(B, 1, num_heads, d).transpose(0, 2, 1, 3)
    kk = (kv @ wik + bik).reshape(B, S, num_heads, d).transpose(0, 2, 1, 3)
    vv = (kv @ wiv + biv).reshape(B, S, num_heads, d).transpose(0, 2, 1, 3)
    scores = jnp.einsum("bhqd,bhkd->bhqk", qq, kk) / math.sqrt(d)
    p = jax.nn.softmax(scores, axis=-1)
    o = jnp.einsum("bhqk,bhkd->bhqd", p, vv).transpose(0, 2, 1, 3).reshape(B, 1, E)
    return (o @ wo + bo)[:, 0, :]


if __name__ == "__main__":
    B, S, E, H = 2, 8, 32, 4

    key = jax.random.PRNGKey(0)
    keys = jax.random.split(key, 13)

    def linear_params(kw, kb):
        # PyTorch-like init U(-1/sqrt(fan_in), 1/sqrt(fan_in)); weight stored (out, in)
        bound = 1.0 / math.sqrt(E)
        w = jax.random.uniform(kw, (E, E), jnp.float32, -bound, bound)
        b = jax.random.uniform(kb, (E,), jnp.float32, -bound, bound)
        return w, b

    wq_t, bq = linear_params(keys[0], keys[1])     # q_proj
    we_t, be = linear_params(keys[2], keys[3])     # embed_proj
    wiq_t, biq = linear_params(keys[4], keys[5])   # MHA in_proj (q)
    wik_t, bik = linear_params(keys[6], keys[7])   # MHA in_proj (k)
    wiv_t, biv = linear_params(keys[8], keys[9])   # MHA in_proj (v)
    wo_t, bo = linear_params(keys[10], keys[11])   # MHA out_proj

    x = jax.random.normal(keys[12], (B, S, E), jnp.float32)

    # (in, out) layout = PyTorch weight transposed
    params = (
        wq_t.T, bq, we_t.T, be,
        wiq_t.T, biq, wik_t.T, bik, wiv_t.T, biv,
        wo_t.T, bo,
    )

    try:
        out = sentence_attention(x, params, num_heads=H)
    except Exception:
        # Fall back to default double-buffering if this JAX build rejects
        # pipeline_mode=pl.Buffered(1) on the grid-invariant operands.
        out = sentence_attention(x, params, num_heads=H,
                                 single_buffer_constants=False)
    out = jax.block_until_ready(out)

    ref = _reference(x, params, H)
    assert out.shape == (B, E)
    err = float(jnp.max(jnp.abs(out - ref)))
    # bf16 MXU operands + pl.reciprocal(approx=True) -> looser tolerance than pure f32
    assert err < 2e-2, f"kernel does not match reference (max abs err {err})"

    print("KERNEL_OK")
</pallas_src>

<mosaic_0001>
module attributes {stable_mosaic.version = 11 : i64} {
  func.func @_sentence_attention_kernel(%arg0: i32, %arg1: memref<2x8x32xbf16, #tpu.memory_space<vmem>>, %arg2: memref<32x384xbf16, #tpu.memory_space<vmem>>, %arg3: memref<1x384xf32, #tpu.memory_space<vmem>>, %arg4: memref<1x32xf32, #tpu.memory_space<vmem>>, %arg5: memref<32x32xbf16, #tpu.memory_space<vmem>>, %arg6: memref<1x32xf32, #tpu.memory_space<vmem>>, %arg7: memref<32x4xbf16, #tpu.memory_space<vmem>>, %arg8: memref<4x32xbf16, #tpu.memory_space<vmem>>, %arg9: memref<2x32xf32, #tpu.memory_space<vmem>>) attributes {dimension_semantics = [#tpu.dimension_semantics<parallel>], iteration_bounds = array<i64: 1>, scalar_prefetch = 0 : i64, scratch_operands = 0 : i64, tpu.core_type = #tpu.core_type<tc>, window_params = [{transform_indices = @transform_0, window_bounds = array<i64: 2, 8, 32>}, {pipeline_mode = #tpu.pipeline_mode<synchronous>, transform_indices = @transform_1, window_bounds = array<i64: 32, 384>}, {pipeline_mode = #tpu.pipeline_mode<synchronous>, transform_indices = @transform_2, window_bounds = array<i64: 1, 384>}, {pipeline_mode = #tpu.pipeline_mode<synchronous>, transform_indices = @transform_3, window_bounds = array<i64: 1, 32>}, {pipeline_mode = #tpu.pipeline_mode<synchronous>, transform_indices = @transform_4, window_bounds = array<i64: 32, 32>}, {pipeline_mode = #tpu.pipeline_mode<synchronous>, transform_indices = @transform_5, window_bounds = array<i64: 1, 32>}, {pipeline_mode = #tpu.pipeline_mode<synchronous>, transform_indices = @transform_6, window_bounds = array<i64: 32, 4>}, {pipeline_mode = #tpu.pipeline_mode<synchronous>, transform_indices = @transform_7, window_bounds = array<i64: 4, 32>}, {transform_indices = @transform_8, window_bounds = array<i64: 2, 32>}]} {
    %c0 = arith.constant 0 : index
    %c0_0 = arith.constant 0 : index
    %c0_1 = arith.constant 0 : index
    %0 = vector.load %arg1[%c0, %c0_0, %c0_1] : memref<2x8x32xbf16, #tpu.memory_space<vmem>>, vector<2x8x32xbf16>
    %1 = vector.shape_cast %0 : vector<2x8x32xbf16> to vector<16x32xbf16>
    %c0_2 = arith.constant 0 : index
    %c0_3 = arith.constant 0 : index
    %2 = vector.load %arg2[%c0_2, %c0_3] : memref<32x384xbf16, #tpu.memory_space<vmem>>, vector<32x384xbf16>
    %cst = arith.constant dense<0.000000e+00> : vector<16x384xf32>
    %3 = tpu.matmul %1, %2, %cst {dimension_numbers = #tpu.dot_dimension_numbers<[1], [0], [0], [1], [0, 0, 1, 1], [], []>} : vector<16x32xbf16>, vector<32x384xbf16>, vector<16x384xf32> -> vector<16x384xf32>
    %c0_4 = arith.constant 0 : index
    %c0_5 = arith.constant 0 : index
    %4 = vector.load %arg3[%c0_4, %c0_5] : memref<1x384xf32, #tpu.memory_space<vmem>>, vector<1x384xf32>
    %5 = vector.broadcast %4 : vector<1x384xf32> to vector<16x384xf32>
    %6 = arith.addf %3, %5 : vector<16x384xf32>
    %7 = vector.extract_strided_slice %6 {offsets = [0, 0], sizes = [16, 32], strides = [1, 1]} : vector<16x384xf32> to vector<16x32xf32>
    %8 = vector.extract_strided_slice %6 {offsets = [0, 128], sizes = [16, 32], strides = [1, 1]} : vector<16x384xf32> to vector<16x32xf32>
    %9 = vector.extract_strided_slice %6 {offsets = [0, 256], sizes = [16, 32], strides = [1, 1]} : vector<16x384xf32> to vector<16x32xf32>
    %10 = vector.shape_cast %9 : vector<16x32xf32> to vector<2x8x32xf32>
    %cst_6 = arith.constant dense<0.000000e+00> : vector<2x32xf32>
    %11 = vector.multi_reduction <add>, %10, %cst_6 [1] : vector<2x8x32xf32> to vector<2x32xf32>
    %c0_7 = arith.constant 0 : index
    %c0_8 = arith.constant 0 : index
    %12 = vector.load %arg4[%c0_7, %c0_8] : memref<1x32xf32, #tpu.memory_space<vmem>>, vector<1x32xf32>
    %13 = vector.broadcast %12 : vector<1x32xf32> to vector<2x32xf32>
    %14 = arith.addf %11, %13 : vector<2x32xf32>
    %15 = vector.shape_cast %7 : vector<16x32xf32> to vector<2x8x32xf32>
    %16 = vector.shape_cast %14 : vector<2x32xf32> to vector<2x1x32xf32>
    %17 = vector.broadcast %16 : vector<2x1x32xf32> to vector<2x8x32xf32>
    %18 = arith.mulf %15, %17 : vector<2x8x32xf32>
    %19 = arith.truncf %18 : vector<2x8x32xf32> to vector<2x8x32xbf16>
    %20 = vector.shape_cast %19 : vector<2x8x32xbf16> to vector<16x32xbf16>
    %c0_9 = arith.constant 0 : index
    %c0_10 = arith.constant 0 : index
    %21 = vector.load %arg7[%c0_9, %c0_10] : memref<32x4xbf16, #tpu.memory_space<vmem>>, vector<32x4xbf16>
    %cst_11 = arith.constant dense<0.000000e+00> : vector<16x4xf32>
    %22 = tpu.matmul %20, %21, %cst_11 {dimension_numbers = #tpu.dot_dimension_numbers<[1], [0], [0], [1], [0, 0, 1, 1], [], []>} : vector<16x32xbf16>, vector<32x4xbf16>, vector<16x4xf32> -> vector<16x4xf32>
    %23 = vector.shape_cast %22 : vector<16x4xf32> to vector<2x8x4xf32>
    %cst_12 = arith.constant dense<0xFF800000> : vector<2x4xf32>
    %24 = vector.multi_reduction <maximumf>, %23, %cst_12 [1] : vector<2x8x4xf32> to vector<2x4xf32>
    %25 = vector.shape_cast %24 : vector<2x4xf32> to vector<2x1x4xf32>
    %26 = vector.broadcast %25 : vector<2x1x4xf32> to vector<2x8x4xf32>
    %27 = arith.subf %23, %26 : vector<2x8x4xf32>
    %28 = math.exp %27 : vector<2x8x4xf32>
    %cst_13 = arith.constant dense<0.000000e+00> : vector<2x4xf32>
    %29 = vector.multi_reduction <add>, %28, %cst_13 [1] : vector<2x8x4xf32> to vector<2x4xf32>
    %30 = vector.shape_cast %29 : vector<2x4xf32> to vector<2x1x4xf32>
    %31 = tpu.reciprocal %30 {approx = true} : vector<2x1x4xf32> -> vector<2x1x4xf32>
    %32 = vector.broadcast %31 : vector<2x1x4xf32> to vector<2x8x4xf32>
    %33 = arith.mulf %28, %32 : vector<2x8x4xf32>
    %34 = vector.shape_cast %33 : vector<2x8x4xf32> to vector<16x4xf32>
    %35 = arith.truncf %34 : vector<16x4xf32> to vector<16x4xbf16>
    %c0_14 = arith.constant 0 : index
    %c0_15 = arith.constant 0 : index
    %36 = vector.load %arg8[%c0_14, %c0_15] : memref<4x32xbf16, #tpu.memory_space<vmem>>, vector<4x32xbf16>
    %cst_16 = arith.constant dense<0.000000e+00> : vector<16x32xf32>
    %37 = tpu.matmul %35, %36, %cst_16 {dimension_numbers = #tpu.dot_dimension_numbers<[1], [0], [0], [1], [0, 0, 1, 1], [], []>} : vector<16x4xbf16>, vector<4x32xbf16>, vector<16x32xf32> -> vector<16x32xf32>
    %38 = arith.mulf %37, %8 : vector<16x32xf32>
    %39 = vector.shape_cast %38 : vector<16x32xf32> to vector<2x8x32xf32>
    %cst_17 = arith.constant dense<0.000000e+00> : vector<2x32xf32>
    %40 = vector.multi_reduction <add>, %39, %cst_17 [1] : vector<2x8x32xf32> to vector<2x32xf32>
    %41 = arith.truncf %40 : vector<2x32xf32> to vector<2x32xbf16>
    %c0_18 = arith.constant 0 : index
    %c0_19 = arith.constant 0 : index
    %42 = vector.load %arg5[%c0_18, %c0_19] : memref<32x32xbf16, #tpu.memory_space<vmem>>, vector<32x32xbf16>
    %cst_20 = arith.constant dense<0.000000e+00> : vector<2x32xf32>
    %43 = tpu.matmul %41, %42, %cst_20 {dimension_numbers = #tpu.dot_dimension_numbers<[1], [0], [0], [1], [0, 0, 1, 1], [], []>} : vector<2x32xbf16>, vector<32x32xbf16>, vector<2x32xf32> -> vector<2x32xf32>
    %c0_21 = arith.constant 0 : index
    %c0_22 = arith.constant 0 : index
    %44 = vector.load %arg6[%c0_21, %c0_22] : memref<1x32xf32, #tpu.memory_space<vmem>>, vector<1x32xf32>
    %45 = vector.broadcast %44 : vector<1x32xf32> to vector<2x32xf32>
    %46 = arith.addf %43, %45 : vector<2x32xf32>
    %c0_23 = arith.constant 0 : index
    %c0_24 = arith.constant 0 : index
    %47 = vector.load %arg9[%c0_23, %c0_24] : memref<2x32xf32, #tpu.memory_space<vmem>>, vector<2x32xf32>
    tpu.vector_store %arg9[%c0_23, %c0_24], %46 {strides = array<i32>} : memref<2x32xf32, #tpu.memory_space<vmem>>, vector<2x32xf32>,
    return
  }
  func.func @transform_0(%arg0: i32) -> (i32, i32, i32) {
    %c0_i32 = arith.constant 0 : i32
    %c0_i32_0 = arith.constant 0 : i32
    %c0_i32_1 = arith.constant 0 : i32
    return %arg0, %c0_i32, %c0_i32_0 : i32, i32, i32
  }
  func.func @transform_1(%arg0: i32) -> (i32, i32) {
    %c0_i32 = arith.constant 0 : i32
    %c0_i32_0 = arith.constant 0 : i32
    %c0_i32_1 = arith.constant 0 : i32
    return %c0_i32, %c0_i32_0 : i32, i32
  }
  func.func @transform_2(%arg0: i32) -> (i32, i32) {
    %c0_i32 = arith.constant 0 : i32
    %c0_i32_0 = arith.constant 0 : i32
    %c0_i32_1 = arith.constant 0 : i32
    return %c0_i32, %c0_i32_0 : i32, i32
  }
  func.func @transform_3(%arg0: i32) -> (i32, i32) {
    %c0_i32 = arith.constant 0 : i32
    %c0_i32_0 = arith.constant 0 : i32
    %c0_i32_1 = arith.constant 0 : i32
    return %c0_i32, %c0_i32_0 : i32, i32
  }
  func.func @transform_4(%arg0: i32) -> (i32, i32) {
    %c0_i32 = arith.constant 0 : i32
    %c0_i32_0 = arith.constant 0 : i32
    %c0_i32_1 = arith.constant 0 : i32
    return %c0_i32, %c0_i32_0 : i32, i32
  }
  func.func @transform_5(%arg0: i32) -> (i32, i32) {
    %c0_i32 = arith.constant 0 : i32
    %c0_i32_0 = arith.constant 0 : i32
    %c0_i32_1 = arith.constant 0 : i32
    return %c0_i32, %c0_i32_0 : i32, i32
  }
  func.func @transform_6(%arg0: i32) -> (i32, i32) {
    %c0_i32 = arith.constant 0 : i32
    %c0_i32_0 = arith.constant 0 : i32
    %c0_i32_1 = arith.constant 0 : i32
    return %c0_i32, %c0_i32_0 : i32, i32
  }
  func.func @transform_7(%arg0: i32) -> (i32, i32) {
    %c0_i32 = arith.constant 0 : i32
    %c0_i32_0 = arith.constant 0 : i32
    %c0_i32_1 = arith.constant 0 : i32
    return %c0_i32, %c0_i32_0 : i32, i32
  }
  func.func @transform_8(%arg0: i32) -> (i32, i32) {
    %c0_i32 = arith.constant 0 : i32
    %c0_i32_0 = arith.constant 0 : i32
    return %arg0, %c0_i32 : i32, i32
  }
}

module attributes {stable_mosaic.version = 11 : i64} {
  func.func @_sentence_attention_kernel(%arg0: i32, %arg1: memref<2x8x32xbf16, #tpu.memory_space<vmem>>, %arg2: memref<32x384xbf16, #tpu.memory_space<vmem>>, %arg3: memref<1x384xf32, #tpu.memory_space<vmem>>, %arg4: memref<1x32xf32, #tpu.memory_space<vmem>>, %arg5: memref<32x32xbf16, #tpu.memory_space<vmem>>, %arg6: memref<1x32xf32, #tpu.memory_space<vmem>>, %arg7: memref<32x4xbf16, #tpu.memory_space<vmem>>, %arg8: memref<4x32xbf16, #tpu.memory_space<vmem>>, %arg9: memref<2x32xf32, #tpu.memory_space<vmem>>) attributes {dimension_semantics = [#tpu.dimension_semantics<parallel>], iteration_bounds = array<i64: 1>, scalar_prefetch = 0 : i64, scratch_operands = 0 : i64, tpu.core_type = #tpu.core_type<tc>, window_params = [{transform_indices = @transform_0, window_bounds = array<i64: 2, 8, 32>}, {pipeline_mode = #tpu.pipeline_mode<synchronous>, transform_indices = @transform_1, window_bounds = array<i64: 32, 384>}, {pipeline_mode = #tpu.pipeline_mode<synchronous>, transform_indices = @transform_2, window_bounds = array<i64: 1, 384>}, {pipeline_mode = #tpu.pipeline_mode<synchronous>, transform_indices = @transform_3, window_bounds = array<i64: 1, 32>}, {pipeline_mode = #tpu.pipeline_mode<synchronous>, transform_indices = @transform_4, window_bounds = array<i64: 32, 32>}, {pipeline_mode = #tpu.pipeline_mode<synchronous>, transform_indices = @transform_5, window_bounds = array<i64: 1, 32>}, {pipeline_mode = #tpu.pipeline_mode<synchronous>, transform_indices = @transform_6, window_bounds = array<i64: 32, 4>}, {pipeline_mode = #tpu.pipeline_mode<synchronous>, transform_indices = @transform_7, window_bounds = array<i64: 4, 32>}, {transform_indices = @transform_8, window_bounds = array<i64: 2, 32>}]} {
    %c0 = arith.constant 0 : index
    %c0_0 = arith.constant 0 : index
    %c0_1 = arith.constant 0 : index
    %0 = vector.load %arg1[%c0, %c0_0, %c0_1] : memref<2x8x32xbf16, #tpu.memory_space<vmem>>, vector<2x8x32xbf16>
    %1 = vector.shape_cast %0 : vector<2x8x32xbf16> to vector<16x32xbf16>
    %c0_2 = arith.constant 0 : index
    %c0_3 = arith.constant 0 : index
    %2 = vector.load %arg2[%c0_2, %c0_3] : memref<32x384xbf16, #tpu.memory_space<vmem>>, vector<32x384xbf16>
    %cst = arith.constant dense<0.000000e+00> : vector<16x384xf32>
    %3 = tpu.matmul %1, %2, %cst {dimension_numbers = #tpu.dot_dimension_numbers<[1], [0], [0], [1], [0, 0, 1, 1], [], []>} : vector<16x32xbf16>, vector<32x384xbf16>, vector<16x384xf32> -> vector<16x384xf32>
    %c0_4 = arith.constant 0 : index
    %c0_5 = arith.constant 0 : index
    %4 = vector.load %arg3[%c0_4, %c0_5] : memref<1x384xf32, #tpu.memory_space<vmem>>, vector<1x384xf32>
    %5 = vector.broadcast %4 : vector<1x384xf32> to vector<16x384xf32>
    %6 = arith.addf %3, %5 : vector<16x384xf32>
    %7 = vector.extract_strided_slice %6 {offsets = [0, 0], sizes = [16, 32], strides = [1, 1]} : vector<16x384xf32> to vector<16x32xf32>
    %8 = vector.extract_strided_slice %6 {offsets = [0, 128], sizes = [16, 32], strides = [1, 1]} : vector<16x384xf32> to vector<16x32xf32>
    %9 = vector.extract_strided_slice %6 {offsets = [0, 256], sizes = [16, 32], strides = [1, 1]} : vector<16x384xf32> to vector<16x32xf32>
    %10 = vector.shape_cast %9 : vector<16x32xf32> to vector<2x8x32xf32>
    %cst_6 = arith.constant dense<0.000000e+00> : vector<2x32xf32>
    %11 = vector.multi_reduction <add>, %10, %cst_6 [1] : vector<2x8x32xf32> to vector<2x32xf32>
    %c0_7 = arith.constant 0 : index
    %c0_8 = arith.constant 0 : index
    %12 = vector.load %arg4[%c0_7, %c0_8] : memref<1x32xf32, #tpu.memory_space<vmem>>, vector<1x32xf32>
    %13 = vector.broadcast %12 : vector<1x32xf32> to vector<2x32xf32>
    %14 = arith.addf %11, %13 : vector<2x32xf32>
    %15 = vector.shape_cast %7 : vector<16x32xf32> to vector<2x8x32xf32>
    %16 = vector.shape_cast %14 : vector<2x32xf32> to vector<2x1x32xf32>
    %17 = vector.broadcast %16 : vector<2x1x32xf32> to vector<2x8x32xf32>
    %18 = arith.mulf %15, %17 : vector<2x8x32xf32>
    %19 = arith.truncf %18 : vector<2x8x32xf32> to vector<2x8x32xbf16>
    %20 = vector.shape_cast %19 : vector<2x8x32xbf16> to vector<16x32xbf16>
    %c0_9 = arith.constant 0 : index
    %c0_10 = arith.constant 0 : index
    %21 = vector.load %arg7[%c0_9, %c0_10] : memref<32x4xbf16, #tpu.memory_space<vmem>>, vector<32x4xbf16>
    %cst_11 = arith.constant dense<0.000000e+00> : vector<16x4xf32>
    %22 = tpu.matmul %20, %21, %cst_11 {dimension_numbers = #tpu.dot_dimension_numbers<[1], [0], [0], [1], [0, 0, 1, 1], [], []>} : vector<16x32xbf16>, vector<32x4xbf16>, vector<16x4xf32> -> vector<16x4xf32>
    %23 = vector.shape_cast %22 : vector<16x4xf32> to vector<2x8x4xf32>
    %cst_12 = arith.constant dense<0xFF800000> : vector<2x4xf32>
    %24 = vector.multi_reduction <maximumf>, %23, %cst_12 [1] : vector<2x8x4xf32> to vector<2x4xf32>
    %25 = vector.shape_cast %24 : vector<2x4xf32> to vector<2x1x4xf32>
    %26 = vector.broadcast %25 : vector<2x1x4xf32> to vector<2x8x4xf32>
    %27 = arith.subf %23, %26 : vector<2x8x4xf32>
    %28 = math.exp %27 : vector<2x8x4xf32>
    %cst_13 = arith.constant dense<0.000000e+00> : vector<2x4xf32>
    %29 = vector.multi_reduction <add>, %28, %cst_13 [1] : vector<2x8x4xf32> to vector<2x4xf32>
    %30 = vector.shape_cast %29 : vector<2x4xf32> to vector<2x1x4xf32>
    %31 = tpu.reciprocal %30 {approx = true} : vector<2x1x4xf32> -> vector<2x1x4xf32>
    %32 = vector.broadcast %31 : vector<2x1x4xf32> to vector<2x8x4xf32>
    %33 = arith.mulf %28, %32 : vector<2x8x4xf32>
    %34 = vector.shape_cast %33 : vector<2x8x4xf32> to vector<16x4xf32>
    %35 = arith.truncf %34 : vector<16x4xf32> to vector<16x4xbf16>
    %c0_14 = arith.constant 0 : index
    %c0_15 = arith.constant 0 : index
    %36 = vector.load %arg8[%c0_14, %c0_15] : memref<4x32xbf16, #tpu.memory_space<vmem>>, vector<4x32xbf16>
    %cst_16 = arith.constant dense<0.000000e+00> : vector<16x32xf32>
    %37 = tpu.matmul %35, %36, %cst_16 {dimension_numbers = #tpu.dot_dimension_numbers<[1], [0], [0], [1], [0, 0, 1, 1], [], []>} : vector<16x4xbf16>, vector<4x32xbf16>, vector<16x32xf32> -> vector<16x32xf32>
    %38 = arith.mulf %37, %8 : vector<16x32xf32>
    %39 = vector.shape_cast %38 : vector<16x32xf32> to vector<2x8x32xf32>
    %cst_17 = arith.constant dense<0.000000e+00> : vector<2x32xf32>
    %40 = vector.multi_reduction <add>, %39, %cst_17 [1] : vector<2x8x32xf32> to vector<2x32xf32>
    %41 = arith.truncf %40 : vector<2x32xf32> to vector<2x32xbf16>
    %c0_18 = arith.constant 0 : index
    %c0_19 = arith.constant 0 : index
    %42 = vector.load %arg5[%c0_18, %c0_19] : memref<32x32xbf16, #tpu.memory_space<vmem>>, vector<32x32xbf16>
    %cst_20 = arith.constant dense<0.000000e+00> : vector<2x32xf32>
    %43 = tpu.matmul %41, %42, %cst_20 {dimension_numbers = #tpu.dot_dimension_numbers<[1], [0], [0], [1], [0, 0, 1, 1], [], []>} : vector<2x32xbf16>, vector<32x32xbf16>, vector<2x32xf32> -> vector<2x32xf32>
    %c0_21 = arith.constant 0 : index
    %c0_22 = arith.constant 0 : index
    %44 = vector.load %arg6[%c0_21, %c0_22] : memref<1x32xf32, #tpu.memory_space<vmem>>, vector<1x32xf32>
    %45 = vector.broadcast %44 : vector<1x32xf32> to vector<2x32xf32>
    %46 = arith.addf %43, %45 : vector<2x32xf32>
    %c0_23 = arith.constant 0 : index
    %c0_24 = arith.constant 0 : index
    %47 = vector.load %arg9[%c0_23, %c0_24] : memref<2x32xf32, #tpu.memory_space<vmem>>, vector<2x32xf32>
    tpu.vector_store %arg9[%c0_23, %c0_24], %46 {strides = array<i32>} : memref<2x32xf32, #tpu.memory_space<vmem>>, vector<2x32xf32>,
    return
  }
  func.func @transform_0(%arg0: i32) -> (i32, i32, i32) {
    %c0_i32 = arith.constant 0 : i32
    %c0_i32_0 = arith.constant 0 : i32
    %c0_i32_1 = arith.constant 0 : i32
    return %arg0, %c0_i32, %c0_i32_0 : i32, i32, i32
  }
  func.func @transform_1(%arg0: i32) -> (i32, i32) {
    %c0_i32 = arith.constant 0 : i32
    %c0_i32_0 = arith.constant 0 : i32
    %c0_i32_1 = arith.constant 0 : i32
    return %c0_i32, %c0_i32_0 : i32, i32
  }
  func.func @transform_2(%arg0: i32) -> (i32, i32) {
    %c0_i32 = arith.constant 0 : i32
    %c0_i32_0 = arith.constant 0 : i32
    %c0_i32_1 = arith.constant 0 : i32
    return %c0_i32, %c0_i32_0 : i32, i32
  }
  func.func @transform_3(%arg0: i32) -> (i32, i32) {
    %c0_i32 = arith.constant 0 : i32
    %c0_i32_0 = arith.constant 0 : i32
    %c0_i32_1 = arith.constant 0 : i32
    return %c0_i32, %c0_i32_0 : i32, i32
  }
  func.func @transform_4(%arg0: i32) -> (i32, i32) {
    %c0_i32 = arith.constant 0 : i32
    %c0_i32_0 = arith.constant 0 : i32
    %c0_i32_1 = arith.constant 0 : i32
    return %c0_i32, %c0_i32_0 : i32, i32
  }
  func.func @transform_5(%arg0: i32) -> (i32, i32) {
    %c0_i32 = arith.constant 0 : i32
    %c0_i32_0 = arith.constant 0 : i32
    %c0_i32_1 = arith.constant 0 : i32
    return %c0_i32, %c0_i32_0 : i32, i32
  }
  func.func @transform_6(%arg0: i32) -> (i32, i32) {
    %c0_i32 = arith.constant 0 : i32
    %c0_i32_0 = arith.constant 0 : i32
    %c0_i32_1 = arith.constant 0 : i32
    return %c0_i32, %c0_i32_0 : i32, i32
  }
  func.func @transform_7(%arg0: i32) -> (i32, i32) {
    %c0_i32 = arith.constant 0 : i32
    %c0_i32_0 = arith.constant 0 : i32
    %c0_i32_1 = arith.constant 0 : i32
    return %c0_i32, %c0_i32_0 : i32, i32
  }
  func.func @transform_8(%arg0: i32) -> (i32, i32) {
    %c0_i32 = arith.constant 0 : i32
    %c0_i32_0 = arith.constant 0 : i32
    return %arg0, %c0_i32 : i32, i32
  }
}

</mosaic_0001>

<bundles_post_ra>
// kernel: tpu_custom_call.1
= control target key start
LH: loop header
LB: loop body
LE: loop exit
PB: predicated region body
PF: predicated region fallthrough
CT: control target
= control target key end

     0   :  { %13 = vsyncpa [#allocation3], 0  ;;  %s778_s0 = inlined_call_operand.vmem [shape: bf16[2,8,32], index: 0, kind: input, shape index: {}]   ;;  %s779_s1 = inlined_call_operand.hbm [shape: bf16[32,384], index: 1, kind: input, shape index: {}]   ;;  %s780_s2 = inlined_call_operand.vmem [shape: f32[1,384], index: 2, kind: input, shape index: {}]   ;;  %s781_s3 = inlined_call_operand.vmem [shape: f32[1,32], index: 3, kind: input, shape index: {}]   ;;  %s782_s4 = inlined_call_operand.vmem [shape: bf16[32,32], index: 4, kind: input, shape index: {}]   ;;  %s783_s5 = inlined_call_operand.vmem [shape: f32[1,32], index: 5, kind: input, shape index: {}]   ;;  %s784_s6 = inlined_call_operand.vmem [shape: bf16[32,4], index: 6, kind: input, shape index: {}]   ;;  %s785_s7 = inlined_call_operand.vmem [shape: bf16[4,32], index: 7, kind: input, shape index: {}]   ;;  %s786_s8 = inlined_call_operand.hbm [shape: f32[2,32], index: 8, kind: output, shape index: {}]  }
   0x1   :  { %14 = vsyncpa [#allocation4], 0  ;;  %s631_s27 = smov [#allocation2]   ;;  %s583_s9 = scalar_lea.hbm %s779_s1, 768 }
   0x2   :  { %s22_s28 = sshll.u32 %s631_s27, 4  ;;  %p584_p0 = scmp.ne.s32.totalorder %s779_s1, %s583_s9  ;;  %s23_s28 = int_to_ptr.vmem [resolvable:$true] %s22_s28 }
   0x3   :  { %p587_p1 = scmp.lt.u32.totalorder %s583_s9, %s779_s1 }
   0x5   :  { %p589_p2 = pnand %p587_p1, %p584_p0 }
   0x7   :  { %592 = shalt.err (!%p589_p2)
}
   0x8   :  { %s593_s14 = scalar_lea.vmem %s23_s28, 768  ;;  %p598_p4 = scmp.lt.s32.totalorder %s23_s28, %s23_s28 }
   0x9   :  { %p594_p3 = scmp.ne.s32.totalorder %s23_s28, %s593_s14  ;;  %p599_p5 = scmp.lt.s32.totalorder %s593_s14, %s593_s14 }
   0xb   :  { %p600_p6 = por %p599_p5, %p598_p4 }
   0xd   :  { %p601_p7 = pnand %p600_p6, %p594_p3 }
   0xf   :  { %604 = shalt.err (!%p601_p7)
}
  0x10   :  { %s632_s15 = smov 192   ;;  %s633_s16 = smov 12  }
  0x11   :  { %28 = dma.hbm_to_vmem [thread:$0]  %s779_s1, 768, %s23_s28, [#allocation3], %s632_s15, %s632_s15, %s633_s16  }
  0x12   :  { %627 = dma.done.wait [#allocation3], 768  }
  0x13   :  { %628 = vsyncadd [#allocation3], 4294966528  ;;  %v634_v0 = vmov 0.0   ;;  %vm635_vm0 = vmmov 0   ;;  %v636_v1 = vmov 0   ;;  %v564_v6 = vld [vmem:[%s778_s0] sm:$0xff]   ;;  %v57_v11 = vlaneseq }
  0x14   :  { %525 = vmatprep.subr.bf16.mxu1 %v634_v0  ;;  %529 = vmatprep.mubr.msk.bf16.mxu1 %vm635_vm0, %v634_v0  ;;  %v562_v2 = vld [vmem:[#allocation2 + $0x8] ss:$12 sps:$4 sm:$0xff]   ;;  %v563_v3 = vld [vmem:[#allocation2 + $0x20] ss:$12 sps:$4 sm:$0xff]   ;;  %v565_v4 = vld [vmem:[#allocation2 + $0x4] ss:$12 sps:$4 sm:$0xff]  }
  0x15   :  { %145 = vmatprep.mubr.bf16.mxu0 %v636_v1  ;;  %526 = vmatpush3.bf16.msra.mxu1 %v562_v2  ;;  %v567_v5 = vld [vmem:[#allocation2] ss:$12 sps:$4 sm:$0xff]   ;;  %vm109_vm1 = vcmask 261120   ;;  %v568_v7 = vld [vmem:[#allocation2 + $0x1c] ss:$12 sps:$4 sm:$0xff]   ;;  %v718_v12 = vshrl.u32 %v57_v11, 7 }
  0x16   :  { %527 = vmatprep.subr.bf16.mxu1 %v634_v0  ;;  %113 = vmatprep.subr.bf16.mxu0 %v565_v4  ;;  %v570_v8 = vld [vmem:[#allocation2 + $0x18] ss:$12 sps:$4 sm:$0xff]   ;;  %v572_v10 = vld [vmem:[%s784_s6 + $0x8] sm:$0xff]   ;;  %v724_v14 = vld [vmem:[%s780_s2] sm:$0x7]  ;;  %vm341_vm2 = vcmask 1041408  }
  0x17   :  { %114 = vmatpush1.bf16.msra.mxu0 %v567_v5  ;;  %v571_v9 = vld [vmem:[%s784_s6] sm:$0xff]   ;;  %v67_v13 = vsub.s32 2, %v718_v12  ;;  %v59_v33 = vsub.s32 0, %v718_v12  ;;  %vm297_vm3 = vcmask 31744   ;;  %vm419_vm4 = vcmask 1041409   ;;  %s637_s30 = smov [#allocation5]  }
  0x18   :  { %115 = vmatprep.subr.bf16.mxu0 %v568_v7  ;;  %v503_v39 = vld [vmem:[%s781_s3] ss:$0 sm:$0xff]  ;;  %s485_s9 = sshll.u32 %s637_s30, 4  ;;  %vm477_vm5 = vcmask 254976   ;;  %s486_s9 = int_to_ptr.vmem [resolvable:$true] %s485_s9 }
  0x19   :  { %528 = vmatpush3.bf16.msra.mxu1 %v563_v3  ;;  %v68_v15 = vrot.slane %v724_v14, %v67_v13  ;;  %v60_v38 = vrot.slane %v724_v14, %v59_v33  ;;  %v337_v52 = vld [vmem:[%s785_s7] sm:$0x3]  ;;  %s605_s10 = scalar_lea.vmem %s486_s9, 32  ;;  %p610_p9 = scmp.lt.s32.totalorder %s486_s9, %s486_s9 }
  0x1a   :  { %541 = vmatprep.subr.bf16.mxu1 %v634_v0  ;;  %v343_v53 = vsel %vm341_vm2, %v337_v52, 0  ;;  %p606_p8 = scmp.ne.s32.totalorder %s486_s9, %s605_s10  ;;  %p611_p10 = scmp.lt.s32.totalorder %s605_s10, %s605_s10 }
  0x1b   :  { %116 = vmatpush1.bf16.msra.mxu0 %v570_v8 }
  0x1c   :  { %530 = vmatmul.mubr.msk.bf16.vlgmr.msra.gmra.mrb[0].mxu1 %vm109_vm1, %v564_v6  ;;  %533 = vmatprep.subr.bf16.mxu0 %v634_v0  ;;  %p612_p11 = por %p611_p10, %p610_p9 }
  0x1d   :  { %543 = vmatprep.mubr.msk.bf16.mxu1 %vm635_vm0, %v634_v0  ;;  %542 = vmatpush3.bf16.msra.mxu1 %v343_v53 }
  0x1e   :  { %501 = vmatmul.mubr.msk.bf16.vlgmr.msra.gmra.mrb[0].mxu0 %vm109_vm1, %v564_v6  ;;  %p613_p12 = pnand %p612_p11, %p606_p8 }
  0x1f   :  { %537 = vmatprep.mubr.msk.bf16.mxu0 %vm635_vm0, %v634_v0  ;;  %534 = vmatpush3.bf16.msra.mxu0 %v571_v9 }
  0x20   :  { %535 = vmatprep.subr.bf16.mxu0 %v634_v0 }
  0x23   :  { %536 = vmatpush3.bf16.msra.mxu0 %v572_v10 }
  0x24   :  { %547 = vmatprep.subr.bf16.mxu0 %v634_v0 }
  0xef   :  { %v190_v16 = vpop.f32.mrb[0].mxu1 }
  0xf0   :  { %v191_v17 = vadd.f32 %v190_v16, %v68_v15  ;;  %v531_v18 = vpop.f32.mrb[1].mxu1 }
  0xf1   :  { %v193_v19 = vpop.f32.mrb[2].mxu1  ;;  %v147_v24 = vpop.f32.mrb[0].mxu0 }
  0xf2   :  { %v197_v20 = vsel %vm109_vm1, %v191_v17, 0.0  ;;  %v194_v21 = vadd.f32 %v193_v19, %v68_v15  ;;  %v532_v22 = vpop.f32.mrb[3].mxu1  ;;  %v729_v26 = vpop.f32.mrb[1].mxu0  ;;  %v148_v43 = vadd.f32 %v147_v24, %v60_v38 }
  0xf3   :  { %v198_v23 = vrot.slane %v197_v20, 4  ;;  %v151_v29 = vpop.f32.mrb[2].mxu0 }
  0xf4   :  { %v204_v25 = vsel %vm109_vm1, %v194_v21, 0.0  ;;  %v731_v30 = vpop.f32.mrb[3].mxu0  ;;  %v152_v48 = vadd.f32 %v151_v29, %v60_v38  ;;  %v573_v38 = vld [vmem:[%s782_s4] sm:$0xff]  }
  0xf5   :  { %v199_v27 = vadd.f32 %v198_v23, %v197_v20  ;;  %v205_v28 = vrot.slane %v204_v25, 4 }
  0xf7   :  { %v200_v31 = vrot.slane %v199_v27, 2  ;;  %v206_v32 = vadd.f32 %v205_v28, %v204_v25 }
  0xf9   :  { %v201_v34 = vadd.f32 %v200_v31, %v199_v27  ;;  %v207_v35 = vrot.slane %v206_v32, 2 }
  0xfb   :  { %v202_v36 = vrot.slane %v201_v34, 1  ;;  %v208_v37 = vadd.f32 %v207_v35, %v206_v32 }
  0xfd   :  { %v203_v40 = vadd.f32 %v202_v36, %v201_v34  ;;  %v209_v41 = vrot.slane %v208_v37, 1 }
  0xff   :  { %v210_v42 = vadd.f32 %v209_v41, %v208_v37  ;;  %v218_v44 = vadd.f32 %v503_v39, %v203_v40  ;;  %v63_v40 = vsub.s32 1, %v718_v12 }
 0x101   :  { %v223_v45 = vrot.slane %v218_v44, %v59_v33  ;;  %v219_v46 = vadd.f32 %v503_v39, %v210_v42  ;;  %v574_v39 = vld [vmem:[%s782_s4 + $0x8] sm:$0xff]   ;;  %v64_v41 = vrot.slane %v724_v14, %v63_v40 }
 0x103   :  { %v228_v47 = vmul.f32 %v223_v45, %v148_v43  ;;  %v227_v49 = vrot.slane %v219_v46, %v59_v33  ;;  %v150_v42 = vadd.f32 %v729_v26, %v64_v41  ;;  %v154_v44 = vadd.f32 %v731_v30, %v64_v41 }
 0x105   :  { %v229_v50 = vmul.f32 %v227_v49, %v152_v48 }
 0x107   :  { %v513_v51 = vpack.c.bf16 %v229_v50, %v228_v47 }
 0x109   :  { %538 = vmatmul.mubr.msk.bf16.vlgmr.msra.gmra.mrb[4].mxu0 %vm109_vm1, %v513_v51 }
 0x10a   :  { %551 = vmatprep.mubr.msk.bf16.mxu0 %vm635_vm0, %v634_v0  ;;  %548 = vmatpush3.bf16.msra.mxu0 %v573_v38 }
 0x10b   :  { %549 = vmatprep.subr.bf16.mxu0 %v634_v0 }
 0x10e   :  { %550 = vmatpush3.bf16.msra.mxu0 %v574_v39 }
 0x1dc   :  { %v290_v54 = vpop.f32.mrb[4].mxu0 }
 0x1dd   :  { %v298_v55 = vsel %vm297_vm3, %v290_v54, -inf  ;;  %v539_v56 = vpop.f32.mrb[5].mxu0 }
 0x1de   :  { %v299_v57 = vrot.slane %v298_v55, 4  ;;  %v293_v58 = vpop.f32.mrb[6].mxu0 }
 0x1df   :  { %v305_v59 = vsel %vm297_vm3, %v293_v58, -inf  ;;  %v540_v60 = vpop.f32.mrb[7].mxu0 }
 0x1e0   :  { %v300_v61 = vmax.f32 %v298_v55, %v299_v57  ;;  %v306_v62 = vrot.slane %v305_v59, 4 }
 0x1e2   :  { %v301_v63 = vrot.slane %v300_v61, 2  ;;  %v307_v1 = vmax.f32 %v305_v59, %v306_v62 }
 0x1e4   :  { %v302_v2 = vmax.f32 %v300_v61, %v301_v63  ;;  %v308_v3 = vrot.slane %v307_v1, 2 }
 0x1e6   :  { %v303_v4 = vrot.slane %v302_v2, 1  ;;  %v309_v5 = vmax.f32 %v307_v1, %v308_v3 }
 0x1e8   :  { %v304_v6 = vmax.f32 %v302_v2, %v303_v4  ;;  %v310_v7 = vrot.slane %v309_v5, 1  ;;  %v509_v2 = vld [vmem:[%s783_s5] ss:$0 sm:$0xff] }
 0x1ea   :  { %v312_v8 = vsub.f32 %v290_v54, %v304_v6  ;;  %v311_v9 = vmax.f32 %v309_v5, %v310_v7 }
 0x1ec   :  { %v314_v10 = vmul.f32 1.442695, %v312_v8  ;;  %v313_v11 = vsub.f32 %v293_v58, %v311_v9 }
 0x1ee   :  { %575 = vpow2.f32 %v314_v10  ;;  %v316_v13 = vmul.f32 1.442695, %v313_v11 }
 0x1f0   :  { %577 = vpow2.f32 %v316_v13 }
 0x1f8   :  { %v576_v15 = vpop.eup %575 }
 0x1f9   :  { %v318_v16 = vsel %vm297_vm3, %v576_v15, 0.0 }
 0x1fa   :  { %v578_v17 = vpop.eup %577  ;;  %v319_v18 = vrot.slane %v318_v16, 4 }
 0x1fb   :  { %v325_v19 = vsel %vm297_vm3, %v578_v17, 0.0 }
 0x1fc   :  { %v320_v20 = vadd.f32 %v319_v18, %v318_v16  ;;  %v326_v21 = vrot.slane %v325_v19, 4 }
 0x1fe   :  { %v321_v22 = vrot.slane %v320_v20, 2  ;;  %v327_v23 = vadd.f32 %v326_v21, %v325_v19 }
 0x200   :  { %v322_v24 = vadd.f32 %v321_v22, %v320_v20  ;;  %v328_v25 = vrot.slane %v327_v23, 2 }
 0x202   :  { %v323_v27 = vrot.slane %v322_v24, 1  ;;  %v329_v28 = vadd.f32 %v328_v25, %v327_v23 }
 0x204   :  { %v324_v29 = vadd.f32 %v323_v27, %v322_v24  ;;  %v330_v31 = vrot.slane %v329_v28, 1 }
 0x206   :  { %579 = vrcp.f32 %v324_v29  ;;  %v331_v32 = vadd.f32 %v330_v31, %v329_v28 }
 0x208   :  { %581 = vrcp.f32 %v331_v32 }
 0x210   :  { %v580_v33 = vpop.eup %579 }
 0x211   :  { %v334_v35 = vmul.f32 %v580_v33, %v576_v15 }
 0x212   :  { %v582_v34 = vpop.eup %581 }
 0x213   :  { %v335_v36 = vmul.f32 %v582_v34, %v578_v17 }
 0x215   :  { %v336_v37 = vpack.c.bf16 %v335_v36, %v334_v35 }
 0x217   :  { %544 = vmatmul.mubr.msk.bf16.vlgmr.msra.gmra.mrb[4].mxu1 %vm297_vm3, %v336_v37 }
 0x2ea   :  { %v379_v43 = vpop.f32.mrb[4].mxu1 }
 0x2eb   :  { %v386_v45 = vmul.f32 %v379_v43, %v150_v42  ;;  %v545_v46 = vpop.f32.mrb[5].mxu1 }
 0x2ec   :  { %v382_v47 = vpop.f32.mrb[6].mxu1 }
 0x2ed   :  { %v388_v48 = vsel %vm109_vm1, %v386_v45, 0.0  ;;  %v387_v0 = vmul.f32 %v382_v47, %v154_v44  ;;  %v546_v49 = vpop.f32.mrb[7].mxu1 }
 0x2ee   :  { %v389_v50 = vrot.slane %v388_v48, 4 }
 0x2ef   :  { %v395_v51 = vsel %vm109_vm1, %v387_v0, 0.0 }
 0x2f0   :  { %v390_v52 = vadd.f32 %v389_v50, %v388_v48  ;;  %v396_v53 = vrot.slane %v395_v51, 4 }
 0x2f2   :  { %v391_v12 = vrot.slane %v390_v52, 2  ;;  %v397_v54 = vadd.f32 %v396_v53, %v395_v51 }
 0x2f4   :  { %v392_v14 = vadd.f32 %v391_v12, %v390_v52  ;;  %v398_v55 = vrot.slane %v397_v54, 2 }
 0x2f6   :  { %v393_v26 = vrot.slane %v392_v14, 1  ;;  %v399_v56 = vadd.f32 %v398_v55, %v397_v54 }
 0x2f8   :  { %v394_v57 = vadd.f32 %v393_v26, %v392_v14  ;;  %v400_v30 = vrot.slane %v399_v56, 1 }
 0x2fa   :  { %v402_v58 = vpack.c.bf16 %v394_v57, %v394_v57  ;;  %v401_v59 = vadd.f32 %v400_v30, %v399_v56 }
 0x2fc   :  { %v403_v60 = vpack.c.bf16 %v401_v59, %v401_v59  ;;  %v417_v61 = vunpack.c.l.b16 %v402_v58 }
 0x2fe   :  { %v418_v62 = vunpack.c.l.b16 %v403_v60 }
 0x300   :  { %v420_v63 = vsel %vm419_vm4, %v418_v62, %v417_v61 }
 0x301   :  { %v421_v1 = vpack.c.b16 %v420_v63, %v420_v63 }
 0x303   :  { %552 = vmatmul.mubr.msk.bf16.vlgmr.msra.gmra.mrb[8].mxu0 %vm109_vm1, %v421_v1 }
 0x3d6   :  { %v471_v3 = vpop.f32.mrb[8].mxu0 }
 0x3d7   :  { %v472_v4 = vadd.f32 %v509_v2, %v471_v3  ;;  %v553_v5 = vpop.f32.mrb[9].mxu0 }
 0x3d8   :  { %v474_v6 = vpop.f32.mrb[10].mxu0 }
 0x3d9   :  { %v554_v7 = vpop.f32.mrb[11].mxu0  ;;  %478 = vst.msk [vmem:[#allocation5] sm:$0x3] %vm477_vm5, %v472_v4 }
 0x3da   :  { %616 = shalt.err (!%p613_p12)
}
 0x3db   :  { %s617_s5 = scalar_lea.hbm %s786_s8, 32 }
 0x3dc   :  { %p618_p13 = scmp.ne.s32.totalorder %s786_s8, %s617_s5  ;;  %p621_p0 = scmp.lt.u32.totalorder %s617_s5, %s786_s8 }
 0x3de   :  { %p623_p1 = pnand %p621_p0, %p618_p13 }
 0x3e0   :  { %626 = shalt.err (!%p623_p1)
}
 0x3e1   :  { %488 = dma.vmem_to_hbm [thread:$0]  %s486_s9, 32, %s786_s8, [#allocation4]  }
 0x3e2   :  { %629 = dma.done.wait [#allocation4], 32  }
 0x3e3   :  { %630 = vsyncadd [#allocation4], 4294967264 }
 0x3e4   :  { %492 = vsyncpa [#allocation3], 1 }
 0x3e5   :  { %493 = vsyncpa [#allocation4], 1 }

// kernel: tpu_custom_call.1
= control target key start
LH: loop header
LB: loop body
LE: loop exit
PB: predicated region body
PF: predicated region fallthrough
CT: control target
= control target key end

     0   :  { %13 = vsyncpa [#allocation3], 0  ;;  %s778_s0 = inlined_call_operand.vmem [shape: bf16[2,8,32], index: 0, kind: input, shape index: {}]   ;;  %s779_s1 = inlined_call_operand.hbm [shape: bf16[32,384], index: 1, kind: input, shape index: {}]   ;;  %s780_s2 = inlined_call_operand.vmem [shape: f32[1,384], index: 2, kind: input, shape index: {}]   ;;  %s781_s3 = inlined_call_operand.vmem [shape: f32[1,32], index: 3, kind: input, shape index: {}]   ;;  %s782_s4 = inlined_call_operand.vmem [shape: bf16[32,32], index: 4, kind: input, shape index: {}]   ;;  %s783_s5 = inlined_call_operand.vmem [shape: f32[1,32], index: 5, kind: input, shape index: {}]   ;;  %s784_s6 = inlined_call_operand.vmem [shape: bf16[32,4], index: 6, kind: input, shape index: {}]   ;;  %s785_s7 = inlined_call_operand.vmem [shape: bf16[4,32], index: 7, kind: input, shape index: {}]   ;;  %s786_s8 = inlined_call_operand.hbm [shape: f32[2,32], index: 8, kind: output, shape index: {}]  }
   0x1   :  { %14 = vsyncpa [#allocation4], 0  ;;  %s631_s27 = smov [#allocation2]   ;;  %s583_s9 = scalar_lea.hbm %s779_s1, 768 }
   0x2   :  { %s22_s28 = sshll.u32 %s631_s27, 4  ;;  %p584_p0 = scmp.ne.s32.totalorder %s779_s1, %s583_s9  ;;  %s23_s28 = int_to_ptr.vmem [resolvable:$true] %s22_s28 }
   0x3   :  { %p587_p1 = scmp.lt.u32.totalorder %s583_s9, %s779_s1 }
   0x5   :  { %p589_p2 = pnand %p587_p1, %p584_p0 }
   0x7   :  { %592 = shalt.err (!%p589_p2)
}
   0x8   :  { %s593_s14 = scalar_lea.vmem %s23_s28, 768  ;;  %p598_p4 = scmp.lt.s32.totalorder %s23_s28, %s23_s28 }
   0x9   :  { %p594_p3 = scmp.ne.s32.totalorder %s23_s28, %s593_s14  ;;  %p599_p5 = scmp.lt.s32.totalorder %s593_s14, %s593_s14 }
   0xb   :  { %p600_p6 = por %p599_p5, %p598_p4 }
   0xd   :  { %p601_p7 = pnand %p600_p6, %p594_p3 }
   0xf   :  { %604 = shalt.err (!%p601_p7)
}
  0x10   :  { %s632_s15 = smov 192   ;;  %s633_s16 = smov 12  }
  0x11   :  { %28 = dma.hbm_to_vmem [thread:$0]  %s779_s1, 768, %s23_s28, [#allocation3], %s632_s15, %s632_s15, %s633_s16  }
  0x12   :  { %627 = dma.done.wait [#allocation3], 768  }
  0x13   :  { %628 = vsyncadd [#allocation3], 4294966528  ;;  %v634_v0 = vmov 0.0   ;;  %vm635_vm0 = vmmov 0   ;;  %v636_v1 = vmov 0   ;;  %v564_v6 = vld [vmem:[%s778_s0] sm:$0xff]   ;;  %v57_v11 = vlaneseq }
  0x14   :  { %525 = vmatprep.subr.bf16.mxu1 %v634_v0  ;;  %529 = vmatprep.mubr.msk.bf16.mxu1 %vm635_vm0, %v634_v0  ;;  %v562_v2 = vld [vmem:[#allocation2 + $0x8] ss:$12 sps:$4 sm:$0xff]   ;;  %v563_v3 = vld [vmem:[#allocation2 + $0x20] ss:$12 sps:$4 sm:$0xff]   ;;  %v565_v4 = vld [vmem:[#allocation2 + $0x4] ss:$12 sps:$4 sm:$0xff]  }
  0x15   :  { %145 = vmatprep.mubr.bf16.mxu0 %v636_v1  ;;  %526 = vmatpush3.bf16.msra.mxu1 %v562_v2  ;;  %v567_v5 = vld [vmem:[#allocation2] ss:$12 sps:$4 sm:$0xff]   ;;  %vm109_vm1 = vcmask 261120   ;;  %v568_v7 = vld [vmem:[#allocation2 + $0x1c] ss:$12 sps:$4 sm:$0xff]   ;;  %v718_v12 = vshrl.u32 %v57_v11, 7 }
  0x16   :  { %527 = vmatprep.subr.bf16.mxu1 %v634_v0  ;;  %113 = vmatprep.subr.bf16.mxu0 %v565_v4  ;;  %v570_v8 = vld [vmem:[#allocation2 + $0x18] ss:$12 sps:$4 sm:$0xff]   ;;  %v572_v10 = vld [vmem:[%s784_s6 + $0x8] sm:$0xff]   ;;  %v724_v14 = vld [vmem:[%s780_s2] sm:$0x7]  ;;  %vm341_vm2 = vcmask 1041408  }
  0x17   :  { %114 = vmatpush1.bf16.msra.mxu0 %v567_v5  ;;  %v571_v9 = vld [vmem:[%s784_s6] sm:$0xff]   ;;  %v67_v13 = vsub.s32 2, %v718_v12  ;;  %v59_v33 = vsub.s32 0, %v718_v12  ;;  %vm297_vm3 = vcmask 31744   ;;  %vm419_vm4 = vcmask 1041409   ;;  %s637_s30 = smov [#allocation5]  }
  0x18   :  { %115 = vmatprep.subr.bf16.mxu0 %v568_v7  ;;  %v503_v39 = vld [vmem:[%s781_s3] ss:$0 sm:$0xff]  ;;  %s485_s9 = sshll.u32 %s637_s30, 4  ;;  %vm477_vm5 = vcmask 254976   ;;  %s486_s9 = int_to_ptr.vmem [resolvable:$true] %s485_s9 }
  0x19   :  { %528 = vmatpush3.bf16.msra.mxu1 %v563_v3  ;;  %v68_v15 = vrot.slane %v724_v14, %v67_v13  ;;  %v60_v38 = vrot.slane %v724_v14, %v59_v33  ;;  %v337_v52 = vld [vmem:[%s785_s7] sm:$0x3]  ;;  %s605_s10 = scalar_lea.vmem %s486_s9, 32  ;;  %p610_p9 = scmp.lt.s32.totalorder %s486_s9, %s486_s9 }
  0x1a   :  { %541 = vmatprep.subr.bf16.mxu1 %v634_v0  ;;  %v343_v53 = vsel %vm341_vm2, %v337_v52, 0  ;;  %p606_p8 = scmp.ne.s32.totalorder %s486_s9, %s605_s10  ;;  %p611_p10 = scmp.lt.s32.totalorder %s605_s10, %s605_s10 }
  0x1b   :  { %116 = vmatpush1.bf16.msra.mxu0 %v570_v8 }
  0x1c   :  { %530 = vmatmul.mubr.msk.bf16.vlgmr.msra.gmra.mrb[0].mxu1 %vm109_vm1, %v564_v6  ;;  %533 = vmatprep.subr.bf16.mxu0 %v634_v0  ;;  %p612_p11 = por %p611_p10, %p610_p9 }
  0x1d   :  { %543 = vmatprep.mubr.msk.bf16.mxu1 %vm635_vm0, %v634_v0  ;;  %542 = vmatpush3.bf16.msra.mxu1 %v343_v53 }
  0x1e   :  { %501 = vmatmul.mubr.msk.bf16.vlgmr.msra.gmra.mrb[0].mxu0 %vm109_vm1, %v564_v6  ;;  %p613_p12 = pnand %p612_p11, %p606_p8 }
  0x1f   :  { %537 = vmatprep.mubr.msk.bf16.mxu0 %vm635_vm0, %v634_v0  ;;  %534 = vmatpush3.bf16.msra.mxu0 %v571_v9 }
  0x20   :  { %535 = vmatprep.subr.bf16.mxu0 %v634_v0 }
  0x23   :  { %536 = vmatpush3.bf16.msra.mxu0 %v572_v10 }
  0x24   :  { %547 = vmatprep.subr.bf16.mxu0 %v634_v0 }
  0xef   :  { %v190_v16 = vpop.f32.mrb[0].mxu1 }
  0xf0   :  { %v191_v17 = vadd.f32 %v190_v16, %v68_v15  ;;  %v531_v18 = vpop.f32.mrb[1].mxu1 }
  0xf1   :  { %v193_v19 = vpop.f32.mrb[2].mxu1  ;;  %v147_v24 = vpop.f32.mrb[0].mxu0 }
  0xf2   :  { %v197_v20 = vsel %vm109_vm1, %v191_v17, 0.0  ;;  %v194_v21 = vadd.f32 %v193_v19, %v68_v15  ;;  %v532_v22 = vpop.f32.mrb[3].mxu1  ;;  %v729_v26 = vpop.f32.mrb[1].mxu0  ;;  %v148_v43 = vadd.f32 %v147_v24, %v60_v38 }
  0xf3   :  { %v198_v23 = vrot.slane %v197_v20, 4  ;;  %v151_v29 = vpop.f32.mrb[2].mxu0 }
  0xf4   :  { %v204_v25 = vsel %vm109_vm1, %v194_v21, 0.0  ;;  %v731_v30 = vpop.f32.mrb[3].mxu0  ;;  %v152_v48 = vadd.f32 %v151_v29, %v60_v38  ;;  %v573_v38 = vld [vmem:[%s782_s4] sm:$0xff]  }
  0xf5   :  { %v199_v27 = vadd.f32 %v198_v23, %v197_v20  ;;  %v205_v28 = vrot.slane %v204_v25, 4 }
  0xf7   :  { %v200_v31 = vrot.slane %v199_v27, 2  ;;  %v206_v32 = vadd.f32 %v205_v28, %v204_v25 }
  0xf9   :  { %v201_v34 = vadd.f32 %v200_v31, %v199_v27  ;;  %v207_v35 = vrot.slane %v206_v32, 2 }
  0xfb   :  { %v202_v36 = vrot.slane %v201_v34, 1  ;;  %v208_v37 = vadd.f32 %v207_v35, %v206_v32 }
  0xfd   :  { %v203_v40 = vadd.f32 %v202_v36, %v201_v34  ;;  %v209_v41 = vrot.slane %v208_v37, 1 }
  0xff   :  { %v210_v42 = vadd.f32 %v209_v41, %v208_v37  ;;  %v218_v44 = vadd.f32 %v503_v39, %v203_v40  ;;  %v63_v40 = vsub.s32 1, %v718_v12 }
 0x101   :  { %v223_v45 = vrot.slane %v218_v44, %v59_v33  ;;  %v219_v46 = vadd.f32 %v503_v39, %v210_v42  ;;  %v574_v39 = vld [vmem:[%s782_s4 + $0x8] sm:$0xff]   ;;  %v64_v41 = vrot.slane %v724_v14, %v63_v40 }
 0x103   :  { %v228_v47 = vmul.f32 %v223_v45, %v148_v43  ;;  %v227_v49 = vrot.slane %v219_v46, %v59_v33  ;;  %v150_v42 = vadd.f32 %v729_v26, %v64_v41  ;;  %v154_v44 = vadd.f32 %v731_v30, %v64_v41 }
 0x105   :  { %v229_v50 = vmul.f32 %v227_v49, %v152_v48 }
 0x107   :  { %v513_v51 = vpack.c.bf16 %v229_v50, %v228_v47 }
 0x109   :  { %538 = vmatmul.mubr.msk.bf16.vlgmr.msra.gmra.mrb[4].mxu0 %vm109_vm1, %v513_v51 }
 0x10a   :  { %551 = vmatprep.mubr.msk.bf16.mxu0 %vm635_vm0, %v634_v0  ;;  %548 = vmatpush3.bf16.msra.mxu0 %v573_v38 }
 0x10b   :  { %549 = vmatprep.subr.bf16.mxu0 %v634_v0 }
 0x10e   :  { %550 = vmatpush3.bf16.msra.mxu0 %v574_v39 }
 0x1dc   :  { %v290_v54 = vpop.f32.mrb[4].mxu0 }
 0x1dd   :  { %v298_v55 = vsel %vm297_vm3, %v290_v54, -inf  ;;  %v539_v56 = vpop.f32.mrb[5].mxu0 }
 0x1de   :  { %v299_v57 = vrot.slane %v298_v55, 4  ;;  %v293_v58 = vpop.f32.mrb[6].mxu0 }
 0x1df   :  { %v305_v59 = vsel %vm297_vm3, %v293_v58, -inf  ;;  %v540_v60 = vpop.f32.mrb[7].mxu0 }
 0x1e0   :  { %v300_v61 = vmax.f32 %v298_v55, %v299_v57  ;;  %v306_v62 = vrot.slane %v305_v59, 4 }
 0x1e2   :  { %v301_v63 = vrot.slane %v300_v61, 2  ;;  %v307_v1 = vmax.f32 %v305_v59, %v306_v62 }
 0x1e4   :  { %v302_v2 = vmax.f32 %v300_v61, %v301_v63  ;;  %v308_v3 = vrot.slane %v307_v1, 2 }
 0x1e6   :  { %v303_v4 = vrot.slane %v302_v2, 1  ;;  %v309_v5 = vmax.f32 %v307_v1, %v308_v3 }
 0x1e8   :  { %v304_v6 = vmax.f32 %v302_v2, %v303_v4  ;;  %v310_v7 = vrot.slane %v309_v5, 1  ;;  %v509_v2 = vld [vmem:[%s783_s5] ss:$0 sm:$0xff] }
 0x1ea   :  { %v312_v8 = vsub.f32 %v290_v54, %v304_v6  ;;  %v311_v9 = vmax.f32 %v309_v5, %v310_v7 }
 0x1ec   :  { %v314_v10 = vmul.f32 1.442695, %v312_v8  ;;  %v313_v11 = vsub.f32 %v293_v58, %v311_v9 }
 0x1ee   :  { %575 = vpow2.f32 %v314_v10  ;;  %v316_v13 = vmul.f32 1.442695, %v313_v11 }
 0x1f0   :  { %577 = vpow2.f32 %v316_v13 }
 0x1f8   :  { %v576_v15 = vpop.eup %575 }
 0x1f9   :  { %v318_v16 = vsel %vm297_vm3, %v576_v15, 0.0 }
 0x1fa   :  { %v578_v17 = vpop.eup %577  ;;  %v319_v18 = vrot.slane %v318_v16, 4 }
 0x1fb   :  { %v325_v19 = vsel %vm297_vm3, %v578_v17, 0.0 }
 0x1fc   :  { %v320_v20 = vadd.f32 %v319_v18, %v318_v16  ;;  %v326_v21 = vrot.slane %v325_v19, 4 }
 0x1fe   :  { %v321_v22 = vrot.slane %v320_v20, 2  ;;  %v327_v23 = vadd.f32 %v326_v21, %v325_v19 }
 0x200   :  { %v322_v24 = vadd.f32 %v321_v22, %v320_v20  ;;  %v328_v25 = vrot.slane %v327_v23, 2 }
 0x202   :  { %v323_v27 = vrot.slane %v322_v24, 1  ;;  %v329_v28 = vadd.f32 %v328_v25, %v327_v23 }
 0x204   :  { %v324_v29 = vadd.f32 %v323_v27, %v322_v24  ;;  %v330_v31 = vrot.slane %v329_v28, 1 }
 0x206   :  { %579 = vrcp.f32 %v324_v29  ;;  %v331_v32 = vadd.f32 %v330_v31, %v329_v28 }
 0x208   :  { %581 = vrcp.f32 %v331_v32 }
 0x210   :  { %v580_v33 = vpop.eup %579 }
 0x211   :  { %v334_v35 = vmul.f32 %v580_v33, %v576_v15 }
 0x212   :  { %v582_v34 = vpop.eup %581 }
 0x213   :  { %v335_v36 = vmul.f32 %v582_v34, %v578_v17 }
 0x215   :  { %v336_v37 = vpack.c.bf16 %v335_v36, %v334_v35 }
 0x217   :  { %544 = vmatmul.mubr.msk.bf16.vlgmr.msra.gmra.mrb[4].mxu1 %vm297_vm3, %v336_v37 }
 0x2ea   :  { %v379_v43 = vpop.f32.mrb[4].mxu1 }
 0x2eb   :  { %v386_v45 = vmul.f32 %v379_v43, %v150_v42  ;;  %v545_v46 = vpop.f32.mrb[5].mxu1 }
 0x2ec   :  { %v382_v47 = vpop.f32.mrb[6].mxu1 }
 0x2ed   :  { %v388_v48 = vsel %vm109_vm1, %v386_v45, 0.0  ;;  %v387_v0 = vmul.f32 %v382_v47, %v154_v44  ;;  %v546_v49 = vpop.f32.mrb[7].mxu1 }
 0x2ee   :  { %v389_v50 = vrot.slane %v388_v48, 4 }
 0x2ef   :  { %v395_v51 = vsel %vm109_vm1, %v387_v0, 0.0 }
 0x2f0   :  { %v390_v52 = vadd.f32 %v389_v50, %v388_v48  ;;  %v396_v53 = vrot.slane %v395_v51, 4 }
 0x2f2   :  { %v391_v12 = vrot.slane %v390_v52, 2  ;;  %v397_v54 = vadd.f32 %v396_v53, %v395_v51 }
 0x2f4   :  { %v392_v14 = vadd.f32 %v391_v12, %v390_v52  ;;  %v398_v55 = vrot.slane %v397_v54, 2 }
 0x2f6   :  { %v393_v26 = vrot.slane %v392_v14, 1  ;;  %v399_v56 = vadd.f32 %v398_v55, %v397_v54 }
 0x2f8   :  { %v394_v57 = vadd.f32 %v393_v26, %v392_v14  ;;  %v400_v30 = vrot.slane %v399_v56, 1 }
 0x2fa   :  { %v402_v58 = vpack.c.bf16 %v394_v57, %v394_v57  ;;  %v401_v59 = vadd.f32 %v400_v30, %v399_v56 }
 0x2fc   :  { %v403_v60 = vpack.c.bf16 %v401_v59, %v401_v59  ;;  %v417_v61 = vunpack.c.l.b16 %v402_v58 }
 0x2fe   :  { %v418_v62 = vunpack.c.l.b16 %v403_v60 }
 0x300   :  { %v420_v63 = vsel %vm419_vm4, %v418_v62, %v417_v61 }
 0x301   :  { %v421_v1 = vpack.c.b16 %v420_v63, %v420_v63 }
 0x303   :  { %552 = vmatmul.mubr.msk.bf16.vlgmr.msra.gmra.mrb[8].mxu0 %vm109_vm1, %v421_v1 }
 0x3d6   :  { %v471_v3 = vpop.f32.mrb[8].mxu0 }
 0x3d7   :  { %v472_v4 = vadd.f32 %v509_v2, %v471_v3  ;;  %v553_v5 = vpop.f32.mrb[9].mxu0 }
 0x3d8   :  { %v474_v6 = vpop.f32.mrb[10].mxu0 }
 0x3d9   :  { %v554_v7 = vpop.f32.mrb[11].mxu0  ;;  %478 = vst.msk [vmem:[#allocation5] sm:$0x3] %vm477_vm5, %v472_v4 }
 0x3da   :  { %616 = shalt.err (!%p613_p12)
}
 0x3db   :  { %s617_s5 = scalar_lea.hbm %s786_s8, 32 }
 0x3dc   :  { %p618_p13 = scmp.ne.s32.totalorder %s786_s8, %s617_s5  ;;  %p621_p0 = scmp.lt.u32.totalorder %s617_s5, %s786_s8 }
 0x3de   :  { %p623_p1 = pnand %p621_p0, %p618_p13 }
 0x3e0   :  { %626 = shalt.err (!%p623_p1)
}
 0x3e1   :  { %488 = dma.vmem_to_hbm [thread:$0]  %s486_s9, 32, %s786_s8, [#allocation4]  }
 0x3e2   :  { %629 = dma.done.wait [#allocation4], 32  }
 0x3e3   :  { %630 = vsyncadd [#allocation4], 4294967264 }
 0x3e4   :  { %492 = vsyncpa [#allocation3], 1 }
 0x3e5   :  { %493 = vsyncpa [#allocation4], 1 }

</bundles_post_ra>
